<compile_context>
chip_gen: v7x
topology: tpu7x:2x2x1
jax: 0.10.0
libtpu: 0.0.40
codegen_flags: <defaults>
</compile_context>

<pallas_src>
import math
import functools

import jax
import jax.numpy as jnp
from jax.experimental import pallas as pl
from jax.experimental.pallas import tpu as pltpu


def _round_up(x, m):
    return ((x + m - 1) // m) * m


def _stacked_gru_kernel(x0_ref, h0_ref, wx0_ref, wih_ref, whh_ref,
                        bgi_ref, bhn_ref, out_ref, gi_ref, carry_ref, *, Hp):
    """One grid step == one GRU layer.

    x0_ref:    (Bp, Xp)        bf16  external input_feed, zero-padded (layer 0 only, resident)
    h0_ref:    (1, Bp, Hp)     f32   this layer's initial hidden, zero-padded
    wx0_ref:   (Xp, 3Hp)       bf16  layer-0 input weights [W_ir|W_iz|W_in] (resident)
    wih_ref:   (1, Hp, 3Hp)    bf16  layer-l (l>0) input weights (streamed, no zero rows)
    whh_ref:   (1, Hp, 3Hp)    bf16  layer-l hidden weights [W_hr|W_hz|W_hn]
    bgi_ref:   (1, 1, 3Hp)     f32   [b_ir+b_hr | b_iz+b_hz | b_in]
    bhn_ref:   (1, 1, Hp)      f32   b_hn
    out_ref:   (1, Bp, Hp)     f32   this layer's new hidden (stacked output)
    gi_ref:    (Bp, 3Hp)       f32   VMEM scratch: input-to-gates matmul result
    carry_ref: (Bp, Hp)        bf16  VMEM scratch: activation carried layer -> layer
    """
    layer = pl.program_id(0)

    # Layer 0 consumes the external input feed against the (Xp, 3Hp) resident
    # weight; layers > 0 consume the bf16 carried activation against a dense
    # (Hp, 3Hp) weight (no padded / zero rows streamed).
    @pl.when(layer == 0)
    def _():
        gi_ref[...] = jnp.dot(x0_ref[...], wx0_ref[...],
                              preferred_element_type=jnp.float32)

    @pl.when(layer != 0)
    def _():
        gi_ref[...] = jnp.dot(carry_ref[...], wih_ref[0],
                              preferred_element_type=jnp.float32)

    h_prev = h0_ref[0]                                          # (Bp, Hp) f32
    gh = jnp.dot(h_prev.astype(jnp.bfloat16), whh_ref[0],
                 preferred_element_type=jnp.float32)            # (Bp, 3Hp) f32

    gi = gi_ref[...] + bgi_ref[0]                               # (Bp, 3Hp)

    rz = jax.nn.sigmoid(gi[:, :2 * Hp] + gh[:, :2 * Hp])
    r = rz[:, :Hp]
    z = rz[:, Hp:]
    n = jnp.tanh(gi[:, 2 * Hp:] + r * (gh[:, 2 * Hp:] + bhn_ref[0]))

    h_new = n + z * (h_prev - n)                                # == (1-z)*n + z*h

    carry_ref[...] = h_new.astype(jnp.bfloat16)
    out_ref[0] = h_new


def stacked_gru_forward(x0, h0, wx0, wih, whh, bgi, bhn, *, Hp, vmem_limit_bytes):
    """Fused forward of the whole stack. Returns (num_layers, Bp, Hp) hidden (f32)."""
    L, Bp, _ = h0.shape
    Xp = x0.shape[1]
    G = 3 * Hp
    kernel = functools.partial(_stacked_gru_kernel, Hp=Hp)
    return pl.pallas_call(
        kernel,
        out_shape=jax.ShapeDtypeStruct((L, Bp, Hp), jnp.float32),
        grid_spec=pltpu.PrefetchScalarGridSpec(
            num_scalar_prefetch=0,
            grid=(L,),
            in_specs=[
                pl.BlockSpec((Bp, Xp), lambda l: (0, 0)),             # x0 (resident)
                pl.BlockSpec((1, Bp, Hp), lambda l: (l, 0, 0)),       # h0[l]
                pl.BlockSpec((Xp, G), lambda l: (0, 0)),              # W_x layer 0 (resident)
                # Layers 1..L-1 input weights; max(l-1,0) means the block fetched
                # at step 0 is layer 1's weight (needed at step 1 anyway -> no
                # wasted DMA, no dummy zero slot).
                pl.BlockSpec((1, Hp, G), lambda l: (jnp.maximum(l - 1, 0), 0, 0)),
                pl.BlockSpec((1, Hp, G), lambda l: (l, 0, 0)),        # W_h[l]
                pl.BlockSpec((1, 1, G), lambda l: (l, 0, 0)),         # bias [r|z|n_in]
                pl.BlockSpec((1, 1, Hp), lambda l: (l, 0, 0)),        # bias b_hn
            ],
            out_specs=pl.BlockSpec((1, Bp, Hp), lambda l: (l, 0, 0)),
            scratch_shapes=[
                pltpu.VMEM((Bp, G), jnp.float32),     # gi scratch
                pltpu.VMEM((Bp, Hp), jnp.bfloat16),   # carried activation (bf16)
            ],
        ),
        compiler_params=pltpu.CompilerParams(
            dimension_semantics=("arbitrary",),       # layers are inherently sequential
            vmem_limit_bytes=int(vmem_limit_bytes),
        ),
    )(x0, h0, wx0, wih, whh, bgi, bhn)


class StackedGRU:
    """JAX/Pallas port of OpenNMT's StackedGRU (input-feeding decoder stack)."""

    def __init__(self, num_layers, input_size, rnn_size, dropout, key):
        self.num_layers = num_layers
        self.input_size = input_size
        self.rnn_size = rnn_size
        self.dropout = dropout
        # TODO(synk): training-mode dropout between layers (nn.Dropout) is not
        #             applied; eval-mode forward (identity) is reproduced exactly.

        H = rnn_size
        self.Hp = _round_up(H, 128)                   # lane-dense gate width
        self.Xp = _round_up(input_size, 128)          # lane-dense input width

        bound = 1.0 / math.sqrt(H)
        self.raw_params = []                          # PyTorch-layout f32 params
        in_size = input_size
        for layer in range(num_layers):
            k = jax.random.fold_in(key, layer)
            k1, k2, k3, k4 = jax.random.split(k, 4)
            w_ih = jax.random.uniform(k1, (3 * H, in_size), jnp.float32, -bound, bound)
            w_hh = jax.random.uniform(k2, (3 * H, H), jnp.float32, -bound, bound)
            b_ih = jax.random.uniform(k3, (3 * H,), jnp.float32, -bound, bound)
            b_hh = jax.random.uniform(k4, (3 * H,), jnp.float32, -bound, bound)
            self.raw_params.append((w_ih, w_hh, b_ih, b_hh))
            in_size = H

        (self.wx0, self.wih, self.whh,
         self.bgi, self.bhn) = self._pack_params()

    def _pack_params(self):
        """Pack per-layer GRU params into dense, padded, bf16 kernel weights.

        No structural-zero gate blocks: W_x is (rows, 3Hp) = [W_ir|W_iz|W_in],
        W_h is (Hp, 3Hp) = [W_hr|W_hz|W_hn]. Layer-0 input weight is stored
        separately (Xp rows); layers > 0 only carry Hp input rows.
        """
        H, Hp, Xp = self.rnn_size, self.Hp, self.Xp
        G = 3 * Hp
        L = self.num_layers

        def pack3(w, rows, rows_pad):
            # w: (3H, rows) torch layout [r; z; n]; returns (rows_pad, 3Hp) bf16.
            W = jnp.zeros((rows_pad, G), jnp.float32)
            for g in range(3):
                W = W.at[:rows, g * Hp:g * Hp + H].set(w[g * H:(g + 1) * H].T)
            return W.astype(jnp.bfloat16)

        # Layer 0 input weight (resident operand).
        w_ih0 = self.raw_params[0][0]
        wx0 = pack3(w_ih0, self.input_size, Xp)

        # Layers 1..L-1 input weights (streamed, Hp rows only).
        wihs = [pack3(self.raw_params[l][0], H, Hp) for l in range(1, L)]
        if not wihs:                                   # degenerate L == 1
            wihs.append(jnp.zeros((Hp, G), jnp.bfloat16))
        wih = jnp.stack(wihs)

        whhs, bgis, bhns = [], [], []
        for (w_ih, w_hh, b_ih, b_hh) in self.raw_params:
            whhs.append(pack3(w_hh, H, Hp))
            bgi = jnp.zeros((1, G), jnp.float32)
            bgi = bgi.at[0, 0 * Hp:0 * Hp + H].set(b_ih[0 * H:1 * H] + b_hh[0 * H:1 * H])
            bgi = bgi.at[0, 1 * Hp:1 * Hp + H].set(b_ih[1 * H:2 * H] + b_hh[1 * H:2 * H])
            bgi = bgi.at[0, 2 * Hp:2 * Hp + H].set(b_ih[2 * H:3 * H])
            bgis.append(bgi)
            bhn = jnp.zeros((1, Hp), jnp.float32).at[0, :H].set(b_hh[2 * H:3 * H])
            bhns.append(bhn)

        return wx0, wih, jnp.stack(whhs), jnp.stack(bgis), jnp.stack(bhns)

    def _vmem_limit(self, Bp):
        """Explicit scoped-VMEM budget: double-buffered blocks + scratch + headroom."""
        Hp, Xp = self.Hp, self.Xp
        G = 3 * Hp
        bf16, f32 = 2, 4
        need = 0
        need += 2 * Bp * Xp * bf16            # x0 block
        need += 2 * Bp * Hp * f32             # h0 block
        need += 2 * Xp * G * bf16             # wx0 (resident, conservatively x2)
        need += 2 * Hp * G * bf16             # wih block
        need += 2 * Hp * G * bf16             # whh block
        need += 2 * 8 * G * f32               # bias gi (sublane-padded)
        need += 2 * 8 * Hp * f32              # bias hn (sublane-padded)
        need += 2 * Bp * Hp * f32             # out block
        need += Bp * G * f32 + Bp * Hp * bf16  # scratch
        need += 2 << 20                       # headroom
        return min(max(need, 4 << 20), 64 << 20)

    def __call__(self, input_feed, hidden):
        """input_feed: (B, input_size); hidden: ((num_layers, B, rnn_size),)"""
        h0 = hidden[0]
        B = input_feed.shape[0]
        H, Hp, Xp = self.rnn_size, self.Hp, self.Xp
        Bp = _round_up(max(B, 8), 8)           # sublane-dense batch

        x0 = jnp.zeros((Bp, Xp), jnp.bfloat16).at[:B, :self.input_size].set(
            input_feed.astype(jnp.bfloat16))
        h0p = jnp.zeros((self.num_layers, Bp, Hp), jnp.float32).at[:, :B, :H].set(h0)

        h1_padded = stacked_gru_forward(
            x0, h0p, self.wx0, self.wih, self.whh, self.bgi, self.bhn,
            Hp=Hp, vmem_limit_bytes=self._vmem_limit(Bp))
        h1 = h1_padded[:, :B, :H]
        return h1[-1], (h1,)


def _reference_forward(raw_params, input_feed, h0):
    """Pure-JAX reference mirroring the kernel numerics (bf16 operands, f32 accum)."""
    x = input_feed
    hs = []
    for (w_ih, w_hh, b_ih, b_hh), h in zip(raw_params, h0):
        H = h.shape[-1]
        gi = jnp.dot(x.astype(jnp.bfloat16), w_ih.T.astype(jnp.bfloat16),
                     preferred_element_type=jnp.float32)
        gh = jnp.dot(h.astype(jnp.bfloat16), w_hh.T.astype(jnp.bfloat16),
                     preferred_element_type=jnp.float32)
        r = jax.nn.sigmoid(gi[:, :H] + gh[:, :H] + (b_ih[:H] + b_hh[:H]))
        z = jax.nn.sigmoid(gi[:, H:2 * H] + gh[:, H:2 * H]
                           + (b_ih[H:2 * H] + b_hh[H:2 * H]))
        n = jnp.tanh(gi[:, 2 * H:] + b_ih[2 * H:] + r * (gh[:, 2 * H:] + b_hh[2 * H:]))
        h_new = n + z * (h - n)
        x = h_new
        hs.append(h_new)
    return x, jnp.stack(hs)


if __name__ == "__main__":
    num_layers = 3
    input_size = 48
    rnn_size = 32
    batch = 4

    key = jax.random.PRNGKey(0)
    k_params, k_x, k_h = jax.random.split(key, 3)

    model = StackedGRU(num_layers, input_size, rnn_size, dropout=0.0, key=k_params)

    input_feed = jax.random.normal(k_x, (batch, input_size), jnp.float32)
    hidden = (jax.random.normal(k_h, (num_layers, batch, rnn_size), jnp.float32),)

    out, (h_1,) = model(input_feed, hidden)
    out = jax.block_until_ready(out)
    h_1 = jax.block_until_ready(h_1)

    ref_out, ref_h1 = _reference_forward(model.raw_params, input_feed, hidden[0])

    assert out.shape == (batch, rnn_size)
    assert h_1.shape == (num_layers, batch, rnn_size)
    assert jnp.allclose(out, ref_out, atol=1e-4, rtol=1e-4), \
        float(jnp.max(jnp.abs(out - ref_out)))
    assert jnp.allclose(h_1, ref_h1, atol=1e-4, rtol=1e-4), \
        float(jnp.max(jnp.abs(h_1 - ref_h1)))

    print("KERNEL_OK")
</pallas_src>

<mosaic_0001>
module attributes {stable_mosaic.version = 11 : i64} {
  func.func @_stacked_gru_kernel(%arg0: i32, %arg1: memref<8x128xbf16, #tpu.memory_space<vmem>>, %arg2: memref<1x8x128xf32, #tpu.memory_space<vmem>>, %arg3: memref<128x384xbf16, #tpu.memory_space<vmem>>, %arg4: memref<1x128x384xbf16, #tpu.memory_space<vmem>>, %arg5: memref<1x128x384xbf16, #tpu.memory_space<vmem>>, %arg6: memref<1x1x384xf32, #tpu.memory_space<vmem>>, %arg7: memref<1x1x128xf32, #tpu.memory_space<vmem>>, %arg8: memref<1x8x128xf32, #tpu.memory_space<vmem>>, %arg9: memref<8x384xf32, #tpu.memory_space<vmem>>, %arg10: memref<8x128xbf16, #tpu.memory_space<vmem>>) attributes {dimension_semantics = [#tpu.dimension_semantics<arbitrary>], iteration_bounds = array<i64: 3>, scalar_prefetch = 0 : i64, scratch_operands = 2 : i64, tpu.core_type = #tpu.core_type<tc>, window_params = [{pipeline_mode = #tpu.pipeline_mode<synchronous>, transform_indices = @transform_0, window_bounds = array<i64: 8, 128>}, {transform_indices = @transform_1, window_bounds = array<i64: 1, 8, 128>}, {pipeline_mode = #tpu.pipeline_mode<synchronous>, transform_indices = @transform_2, window_bounds = array<i64: 128, 384>}, {transform_indices = @transform_3, window_bounds = array<i64: 1, 128, 384>}, {transform_indices = @transform_4, window_bounds = array<i64: 1, 128, 384>}, {transform_indices = @transform_5, window_bounds = array<i64: 1, 1, 384>}, {transform_indices = @transform_6, window_bounds = array<i64: 1, 1, 128>}, {transform_indices = @transform_7, window_bounds = array<i64: 1, 8, 128>}]} {
    %c0_i32 = arith.constant 0 : i32
    %0 = arith.cmpi eq, %arg0, %c0_i32 : i32
    %1 = arith.extui %0 : i1 to i32
    %c0_i32_0 = arith.constant 0 : i32
    %2 = arith.cmpi ne, %1, %c0_i32_0 : i32
    scf.if %2 {
      %c0_22 = arith.constant 0 : index
      %c0_23 = arith.constant 0 : index
      %44 = vector.load %arg1[%c0_22, %c0_23] : memref<8x128xbf16, #tpu.memory_space<vmem>>, vector<8x128xbf16>
      %c0_24 = arith.constant 0 : index
      %c0_25 = arith.constant 0 : index
      %45 = vector.load %arg3[%c0_24, %c0_25] : memref<128x384xbf16, #tpu.memory_space<vmem>>, vector<128x384xbf16>
      %cst_26 = arith.constant dense<0.000000e+00> : vector<8x384xf32>
      %46 = tpu.matmul %44, %45, %cst_26 {dimension_numbers = #tpu.dot_dimension_numbers<[1], [0], [0], [1], [0, 0, 1, 1], [], []>} : vector<8x128xbf16>, vector<128x384xbf16>, vector<8x384xf32> -> vector<8x384xf32>
      %c0_27 = arith.constant 0 : index
      %c0_28 = arith.constant 0 : index
      %47 = vector.load %arg9[%c0_27, %c0_28] : memref<8x384xf32, #tpu.memory_space<vmem>>, vector<8x384xf32>
      tpu.vector_store %arg9[%c0_27, %c0_28], %46 {strides = array<i32>} : memref<8x384xf32, #tpu.memory_space<vmem>>, vector<8x384xf32>,
    } else {
    }
    %c0_i32_1 = arith.constant 0 : i32
    %3 = arith.cmpi ne, %arg0, %c0_i32_1 : i32
    %4 = arith.extui %3 : i1 to i32
    %c0_i32_2 = arith.constant 0 : i32
    %5 = arith.cmpi ne, %4, %c0_i32_2 : i32
    scf.if %5 {
      %c0_22 = arith.constant 0 : index
      %c0_23 = arith.constant 0 : index
      %44 = vector.load %arg10[%c0_22, %c0_23] : memref<8x128xbf16, #tpu.memory_space<vmem>>, vector<8x128xbf16>
      %c0_24 = arith.constant 0 : index
      %c0_25 = arith.constant 0 : index
      %c0_26 = arith.constant 0 : index
      %45 = vector.load %arg4[%c0_24, %c0_25, %c0_26] : memref<1x128x384xbf16, #tpu.memory_space<vmem>>, vector<1x128x384xbf16>
      %46 = vector.shape_cast %45 : vector<1x128x384xbf16> to vector<128x384xbf16>
      %cst_27 = arith.constant dense<0.000000e+00> : vector<8x384xf32>
      %47 = tpu.matmul %44, %46, %cst_27 {dimension_numbers = #tpu.dot_dimension_numbers<[1], [0], [0], [1], [0, 0, 1, 1], [], []>} : vector<8x128xbf16>, vector<128x384xbf16>, vector<8x384xf32> -> vector<8x384xf32>
      %c0_28 = arith.constant 0 : index
      %c0_29 = arith.constant 0 : index
      %48 = vector.load %arg9[%c0_28, %c0_29] : memref<8x384xf32, #tpu.memory_space<vmem>>, vector<8x384xf32>
      tpu.vector_store %arg9[%c0_28, %c0_29], %47 {strides = array<i32>} : memref<8x384xf32, #tpu.memory_space<vmem>>, vector<8x384xf32>,
    } else {
    }
    %c0 = arith.constant 0 : index
    %c0_3 = arith.constant 0 : index
    %c0_4 = arith.constant 0 : index
    %6 = vector.load %arg2[%c0, %c0_3, %c0_4] : memref<1x8x128xf32, #tpu.memory_space<vmem>>, vector<1x8x128xf32>
    %7 = vector.shape_cast %6 : vector<1x8x128xf32> to vector<8x128xf32>
    %8 = arith.truncf %7 : vector<8x128xf32> to vector<8x128xbf16>
    %c0_5 = arith.constant 0 : index
    %c0_6 = arith.constant 0 : index
    %c0_7 = arith.constant 0 : index
    %9 = vector.load %arg5[%c0_5, %c0_6, %c0_7] : memref<1x128x384xbf16, #tpu.memory_space<vmem>>, vector<1x128x384xbf16>
    %10 = vector.shape_cast %9 : vector<1x128x384xbf16> to vector<128x384xbf16>
    %cst = arith.constant dense<0.000000e+00> : vector<8x384xf32>
    %11 = tpu.matmul %8, %10, %cst {dimension_numbers = #tpu.dot_dimension_numbers<[1], [0], [0], [1], [0, 0, 1, 1], [], []>} : vector<8x128xbf16>, vector<128x384xbf16>, vector<8x384xf32> -> vector<8x384xf32>
    %c0_8 = arith.constant 0 : index
    %c0_9 = arith.constant 0 : index
    %12 = vector.load %arg9[%c0_8, %c0_9] : memref<8x384xf32, #tpu.memory_space<vmem>>, vector<8x384xf32>
    %c0_10 = arith.constant 0 : index
    %c0_11 = arith.constant 0 : index
    %c0_12 = arith.constant 0 : index
    %13 = vector.load %arg6[%c0_10, %c0_11, %c0_12] : memref<1x1x384xf32, #tpu.memory_space<vmem>>, vector<1x1x384xf32>
    %14 = vector.shape_cast %13 : vector<1x1x384xf32> to vector<1x384xf32>
    %15 = vector.broadcast %14 : vector<1x384xf32> to vector<8x384xf32>
    %16 = arith.addf %12, %15 : vector<8x384xf32>
    %17 = vector.extract_strided_slice %16 {offsets = [0, 0], sizes = [8, 256], strides = [1, 1]} : vector<8x384xf32> to vector<8x256xf32>
    %18 = vector.extract_strided_slice %11 {offsets = [0, 0], sizes = [8, 256], strides = [1, 1]} : vector<8x384xf32> to vector<8x256xf32>
    %19 = arith.addf %17, %18 : vector<8x256xf32>
    %20 = arith.negf %19 : vector<8x256xf32>
    %21 = math.exp %20 : vector<8x256xf32>
    %cst_13 = arith.constant 1.000000e+00 : f32
    %22 = vector.broadcast %cst_13 : f32 to vector<8x256xf32>
    %23 = arith.addf %22, %21 : vector<8x256xf32>
    %24 = arith.divf %22, %23 : vector<8x256xf32>
    %25 = vector.extract_strided_slice %24 {offsets = [0, 0], sizes = [8, 128], strides = [1, 1]} : vector<8x256xf32> to vector<8x128xf32>
    %26 = vector.extract_strided_slice %24 {offsets = [0, 128], sizes = [8, 128], strides = [1, 1]} : vector<8x256xf32> to vector<8x128xf32>
    %27 = vector.extract_strided_slice %16 {offsets = [0, 256], sizes = [8, 128], strides = [1, 1]} : vector<8x384xf32> to vector<8x128xf32>
    %28 = vector.extract_strided_slice %11 {offsets = [0, 256], sizes = [8, 128], strides = [1, 1]} : vector<8x384xf32> to vector<8x128xf32>
    %c0_14 = arith.constant 0 : index
    %c0_15 = arith.constant 0 : index
    %c0_16 = arith.constant 0 : index
    %29 = vector.load %arg7[%c0_14, %c0_15, %c0_16] : memref<1x1x128xf32, #tpu.memory_space<vmem>>, vector<1x1x128xf32>
    %30 = vector.shape_cast %29 : vector<1x1x128xf32> to vector<1x128xf32>
    %31 = vector.broadcast %30 : vector<1x128xf32> to vector<8x128xf32>
    %32 = arith.addf %28, %31 : vector<8x128xf32>
    %33 = arith.mulf %25, %32 : vector<8x128xf32>
    %34 = arith.addf %27, %33 : vector<8x128xf32>
    %35 = math.tanh %34 : vector<8x128xf32>
    %36 = arith.subf %7, %35 : vector<8x128xf32>
    %37 = arith.mulf %26, %36 : vector<8x128xf32>
    %38 = arith.addf %35, %37 : vector<8x128xf32>
    %39 = arith.truncf %38 : vector<8x128xf32> to vector<8x128xbf16>
    %c0_17 = arith.constant 0 : index
    %c0_18 = arith.constant 0 : index
    %40 = vector.load %arg10[%c0_17, %c0_18] : memref<8x128xbf16, #tpu.memory_space<vmem>>, vector<8x128xbf16>
    tpu.vector_store %arg10[%c0_17, %c0_18], %39 {strides = array<i32>} : memref<8x128xbf16, #tpu.memory_space<vmem>>, vector<8x128xbf16>,
    %c0_19 = arith.constant 0 : index
    %c0_20 = arith.constant 0 : index
    %c0_21 = arith.constant 0 : index
    %41 = vector.load %arg8[%c0_19, %c0_20, %c0_21] : memref<1x8x128xf32, #tpu.memory_space<vmem>>, vector<1x8x128xf32>
    %42 = vector.shape_cast %41 : vector<1x8x128xf32> to vector<8x128xf32>
    %43 = vector.shape_cast %38 : vector<8x128xf32> to vector<1x8x128xf32>
    tpu.vector_store %arg8[%c0_19, %c0_20, %c0_21], %43 {strides = array<i32>} : memref<1x8x128xf32, #tpu.memory_space<vmem>>, vector<1x8x128xf32>,
    return
  }
  func.func @transform_0(%arg0: i32) -> (i32, i32) {
    %c0_i32 = arith.constant 0 : i32
    %c0_i32_0 = arith.constant 0 : i32
    %c0_i32_1 = arith.constant 0 : i32
    return %c0_i32, %c0_i32_0 : i32, i32
  }
  func.func @transform_1(%arg0: i32) -> (i32, i32, i32) {
    %c0_i32 = arith.constant 0 : i32
    %c0_i32_0 = arith.constant 0 : i32
    %c0_i32_1 = arith.constant 0 : i32
    return %arg0, %c0_i32, %c0_i32_0 : i32, i32, i32
  }
  func.func @transform_2(%arg0: i32) -> (i32, i32) {
    %c0_i32 = arith.constant 0 : i32
    %c0_i32_0 = arith.constant 0 : i32
    %c0_i32_1 = arith.constant 0 : i32
    return %c0_i32, %c0_i32_0 : i32, i32
  }
  func.func @transform_3(%arg0: i32) -> (i32, i32, i32) {
    %c1_i32 = arith.constant 1 : i32
    %0 = arith.subi %arg0, %c1_i32 : i32
    %c0_i32 = arith.constant 0 : i32
    %1 = arith.maxsi %0, %c0_i32 : i32
    %c0_i32_0 = arith.constant 0 : i32
    %c0_i32_1 = arith.constant 0 : i32
    %c0_i32_2 = arith.constant 0 : i32
    return %1, %c0_i32_0, %c0_i32_1 : i32, i32, i32
  }
  func.func @transform_4(%arg0: i32) -> (i32, i32, i32) {
    %c0_i32 = arith.constant 0 : i32
    %c0_i32_0 = arith.constant 0 : i32
    %c0_i32_1 = arith.constant 0 : i32
    return %arg0, %c0_i32, %c0_i32_0 : i32, i32, i32
  }
  func.func @transform_5(%arg0: i32) -> (i32, i32, i32) {
    %c0_i32 = arith.constant 0 : i32
    %c0_i32_0 = arith.constant 0 : i32
    %c0_i32_1 = arith.constant 0 : i32
    return %arg0, %c0_i32, %c0_i32_0 : i32, i32, i32
  }
  func.func @transform_6(%arg0: i32) -> (i32, i32, i32) {
    %c0_i32 = arith.constant 0 : i32
    %c0_i32_0 = arith.constant 0 : i32
    %c0_i32_1 = arith.constant 0 : i32
    return %arg0, %c0_i32, %c0_i32_0 : i32, i32, i32
  }
  func.func @transform_7(%arg0: i32) -> (i32, i32, i32) {
    %c0_i32 = arith.constant 0 : i32
    %c0_i32_0 = arith.constant 0 : i32
    %c0_i32_1 = arith.constant 0 : i32
    return %arg0, %c0_i32, %c0_i32_0 : i32, i32, i32
  }
}

</mosaic_0001>

<bundles_post_ra>
// kernel: tpu_custom_call.1
= control target key start
LH: loop header
LB: loop body
LE: loop exit
PB: predicated region body
PF: predicated region fallthrough
CT: control target
= control target key end

     0   :  { %s2594_s0 = inlined_call_operand.hbm [shape: bf16[8,128], index: 0, kind: input, shape index: {}]   ;;  %s2595_s1 = inlined_call_operand.hbm [shape: f32[3,8,128], index: 1, kind: input, shape index: {}]   ;;  %s2596_s2 = inlined_call_operand.hbm [shape: bf16[128,384], index: 2, kind: input, shape index: {}]   ;;  %s2597_s3 = inlined_call_operand.hbm [shape: bf16[2,128,384], index: 3, kind: input, shape index: {}]   ;;  %s2598_s4 = inlined_call_operand.hbm [shape: bf16[3,128,384], index: 4, kind: input, shape index: {}]   ;;  %s2599_s5 = inlined_call_operand.vmem [shape: f32[3,1,384], index: 5, kind: input, shape index: {}]   ;;  %s2600_s6 = inlined_call_operand.vmem [shape: f32[3,1,128], index: 6, kind: input, shape index: {}]   ;;  %s2601_s7 = inlined_call_operand.hbm [shape: f32[3,8,128], index: 7, kind: output, shape index: {}]  }
   0x1   :  { %2616 = sst [smem:[#allocation25_spill]] %s2594_s0 }
   0x2   :  { %2617 = sst [smem:[#allocation26_spill]] %s2596_s2 }
   0x3   :  { %2618 = sst [smem:[#allocation27_spill]] %s2597_s3 }
   0x4   :  { %2619 = sst [smem:[#allocation28_spill]] %s2601_s7 }
   0x5   :  { %12 = vsyncpa [#allocation5], 0 }
   0x6   :  { %13 = vsyncpa [#allocation8], 0 }
   0x7   :  { %15 = vsyncpa [#allocation8 + $0x1], 0 }
   0x8   :  { %16 = vsyncpa [#allocation11], 0 }
   0x9   :  { %18 = vsyncpa [#allocation11 + $0x1], 0 }
   0xa   :  { %19 = vsyncpa [#allocation6], 0 }
   0xb   :  { %21 = vsyncpa [#allocation6 + $0x1], 0  ;;  %s2127_s24 = smov 0   ;;  %s2129_s25 = smov 0  }
   0xc   :  { %s2131_s26 = smov 0   ;;  %s2133_s27 = smov 0  }
   0xd   :  { %s2135_s28 = smov 0   ;;  %s2137_s29 = smov 0  }
   0xe   :  { %s2139_s30 = smov 0  }
   0xf LB: > { %2620 = sst [smem:[#allocation20_spill]] %s2056_s27  ;;  %s2161_s8 = sadd.s32 4294967295, %s2068_s30   ;;  %s2068_s30 = sphi %s2139_s30, %s2668_s30   ;;  %s2064_s29 = sphi %s2137_s29, %s2662_s29   ;;  %s2060_s28 = sphi %s2135_s28, %s2667_s28   ;;  %s2056_s27 = sphi %s2133_s27, %s2666_s27   ;;  %s2052_s26 = sphi %s2131_s26, %s2665_s26   ;;  %s2048_s25 = sphi %s2129_s25, %s2664_s25   ;;  %s2044_s24 = sphi %s2127_s24, %s2663_s24  }
  0x10   : > { %2621 = sst [smem:[#allocation21_spill]] %s2064_s29  ;;  %s1406_s9 = sadd.s32 4294967294, %s2068_s30  }
  0x11   : > { %p68_p0 = scmp.ne.s32.totalorder %s2060_s28, %s2056_s27  ;;  %p2602_p1 = scmp.eq.s32.totalorder %s2161_s8, 0 }
  0x12   : > { %p121_p2 = scmp.ne.s32.totalorder %s2048_s25, %s2044_s24  ;;  %p229_p3 = scmp.eq.s32.totalorder %s1406_s9, 2 }
  0x13   : > { %p2170_p4 = por %p2602_p1, %p68_p0  ;;  %p1409_p5 = scmp.ge.s32.totalorder %s2068_s30, 1 }
  0x14   : > { %p2177_p6 = por %p121_p2, %p2602_p1  ;;  %p2181_p7 = por %p229_p3, %p68_p0 }
  0x15   : > { %s2622_s10 = scalar_select %p2170_p4, 1, 0 }
  0x16   : > { %s2623_s11 = scalar_select %p2177_p6, 1, 0 }
  0x17   : > { %s2624_s12 = scalar_select %p2181_p7, 1, 0 }
  0x18   : > { %p236_p8 = scmp.lt.s32.totalorder %s2068_s30, 4  ;;  %s2070_s14 = smov [#allocation9]  }
  0x19   : > { %2625 = sst [smem:[#allocation22_spill]] %s2624_s12  ;;  %s259_s15 = sshll.u32 %s2070_s14, 4  ;;  %s2191_s15 = int_to_ptr.vmem [resolvable:$true] %s259_s15 }
  0x1a   : > { %p2187_p10 = pnand %p1409_p5, %p236_p8  ;;  %s2196_s16 = sadd.s32 1, %s2068_s30  }
  0x1b   : > { %s52_s18 = ssub.s32 %s2068_s30, %s2196_s16  ;;  %s2629_s2 = sld [smem:[#allocation26_spill]] }
  0x1c   : > { %s2626_s13 = scalar_select %p2187_p10, 1, 0 }
  0x1d   : > { %p1614_p11 = pneg %p2187_p10  ;;  %p2207_p0 = scmp.eq.s32.totalorder %s52_s18, 0 }
  0x1f   : > { %p2200_p12 = pnand %p1614_p11, %p2602_p1 }
  0x20   : > { %s2628_s19 = scalar_select %p2207_p0, 1, 0 }
  0x21   : > { %s1816_s22 = scalar_lea.hbm %s2629_s2, 3072  ;;  %p2613_p3 = pneg %p2200_p12 }
  0x22   : > { %p1817_p2 = scmp.ne.s32.totalorder %s2629_s2, %s1816_s22  ;;  %p1823_p11 = scmp.lt.u32.totalorder %s1816_s22, %s2629_s2 }
  0x24   : > { %p1819_p5 = pnand %p2613_p3, %p1817_p2 }
  0x26   : > { %p1820_p8 = pneg %p1819_p5 }
  0x28   : > { %p1825_p9 = pnand %p1823_p11, %p1820_p8 }
  0x2a   : > { %1828 = shalt.err (!%p1825_p9)
}
  0x2b   : > { %s1829_s18 = scalar_lea.vmem %s2191_s15, 3072  ;;  %p1837_p6 = scmp.lt.s32.totalorder %s2191_s15, %s2191_s15 }
  0x2c   : > { %p1830_p1 = scmp.ne.s32.totalorder %s2191_s15, %s1829_s18  ;;  %p1838_p2 = scmp.lt.s32.totalorder %s1829_s18, %s1829_s18 }
  0x2e   : > { %p1832_p13 = pnand %p1830_p1, %p2613_p3  ;;  %p1839_p5 = por %p1838_p2, %p1837_p6 }
  0x30   : > { %p1833_p7 = pneg %p1832_p13 }
  0x32   : > { %p1840_p4 = pnand %p1839_p5, %p1833_p7 }
  0x34   : > { %1843 = shalt.err (!%p1840_p4)
}
  0x35   : > { %s2608_s20 = smov 192   ;;  %s2610_s21 = smov 12  }
  0x36   : > { %1620 = dma.hbm_to_vmem [thread:$0]  (!%p2200_p12), %s2629_s2, 3072, %s2191_s15, [#allocation8], %s2608_s20, %s2608_s20, %s2610_s21  }
  0x37   : > { %p100_p1 = scmp.gt.s32.totalorder %s2161_s8, 0  ;;  %s1408_s24 = sadd.s32 4294967295, %s2196_s16 }
  0x38   : > { %p103_p4 = scmp.gt.s32.totalorder %s1408_s24, 0  ;;  %s108_s9 = sadd.s32 1, %s2052_s26 }
  0x39   : > { %s101_s14 = scalar_select %p100_p1, %s2161_s8, 0 }
  0x3a   : > { %s2670_s24 = smov (!%p103_p4, %s1408_s24), 0  ;;  %p115_p6 = scmp.ne.s32.totalorder %s2052_s26, %s2048_s25 }
  0x3b   : > { %p2612_p7 = scmp.lt.s32.totalorder %s2068_s30, 3  ;;  %s105_s18 = ssub.s32 %s101_s14, %s2670_s24 }
  0x3c   : > { %p106_p9 = scmp.eq.s32.totalorder %s105_s18, 0  ;;  %p2630_p13 = scmp.eq.s32.totalorder %s2068_s30, 0 }
  0x3d   : > { %s293_s27 = sand.u32 1, %s2052_s26   ;;  %s1592_s23 = smul.u32 3072, %s101_s14 }
  0x3e   : > { %p117_p8 = por %p115_p6, %p2630_p13  ;;  %s1591_s22 = smul.u32 192, %s293_s27 }
  0x3f   : > { %s2253_s7 = scalar_select %p106_p9, %s2052_s26, %s108_s9  }
  0x40   : > { %p2257_p11 = pnand %p2612_p7, %p117_p8  ;;  %s2633_s3 = sld [smem:[#allocation27_spill]] }
  0x41   : > { %2631 = sst [smem:[#allocation23_spill]] %s2253_s7  ;;  %s295_s9 = scalar_lea.vmem [#allocation10], %s1591_s22 }
  0x42   : > { %s305_s18 = sshll.u32 %s295_s9, 4  ;;  %s2073_s27 = smov [#allocation4]   ;;  %s2266_s18 = int_to_ptr.vmem [resolvable:$true] %s305_s18 }
  0x43   : > { %s2268_s12 = sshll.u32 %s2073_s27, 4  ;;  %s2634_s2 = sand.u32 1, %s2068_s30   ;;  %s250_s12 = int_to_ptr.vmem [resolvable:$true] %s2268_s12 }
  0x44   : > { %s2272_s7 = scalar_lea.sflag [#allocation11], %s2634_s2  ;;  %p1846_p5 = pneg %p2257_p11 }
  0x46   : > { %s2264_s24 = scalar_lea.hbm %s2633_s3, %s1592_s23  ;;  %s1849_s22 = scalar_lea.hbm %s2633_s3, 6144 }
  0x47   : > { %s1844_s14 = scalar_lea.hbm %s2264_s24, 3072  ;;  %p1850_p6 = scmp.lt.u32.totalorder %s2264_s24, %s2633_s3 }
  0x48   : > { %p1845_p2 = scmp.ne.s32.totalorder %s2264_s24, %s1844_s14  ;;  %p1851_p9 = scmp.lt.u32.totalorder %s1849_s22, %s1844_s14 }
  0x49   : > { %p1853_p8 = scmp.lt.u32.totalorder %s1844_s14, %s2264_s24 }
  0x4a   : > { %p1847_p1 = pnand %p1846_p5, %p1845_p2  ;;  %p1852_p13 = por %p1851_p9, %p1850_p6 }
  0x4c   : > { %p1848_p4 = pneg %p1847_p1  ;;  %p1854_p7 = por %p1853_p8, %p1852_p13 }
  0x4e   : > { %p1855_p3 = pnand %p1854_p7, %p1848_p4 }
  0x50   : > { %1858 = shalt.err (!%p1855_p3)
}
  0x51   : > { %s1859_s2 = scalar_lea.vmem %s2266_s18, 3072  ;;  %s2074_s27 = smov [#allocation10]  }
  0x52   : > { %p1860_p2 = scmp.ne.s32.totalorder %s2266_s18, %s1859_s2  ;;  %s1864_s20 = sshll.u32 %s2074_s27, 4  ;;  %s1865_s20 = int_to_ptr.vmem [resolvable:$false] %s1864_s20 }
  0x53   : > { %s1866_s21 = scalar_lea.vmem %s1865_s20, 6144  ;;  %p1867_p0 = scmp.lt.s32.totalorder %s2266_s18, %s1865_s20 }
  0x54   : > { %p1862_p1 = pnand %p1860_p2, %p1846_p5  ;;  %p1868_p6 = scmp.lt.s32.totalorder %s1866_s21, %s1859_s2 }
  0x56   : > { %p1863_p10 = pneg %p1862_p1  ;;  %p1869_p9 = por %p1868_p6, %p1867_p0 }
  0x58   : > { %p1870_p13 = pnand %p1869_p9, %p1863_p10 }
  0x5a   : > { %1873 = shalt.err (!%p1870_p13)
}
  0x5b   : > { %s2635_s14 = smov 12   ;;  %s2636_s22 = smov 192  }
  0x5c   : > { %1627 = dma.hbm_to_vmem [thread:$0]  (!%p2257_p11), %s2264_s24, 3072, %s2266_s18, %s2272_s7, %s2636_s22, %s2636_s22, %s2635_s14  }
  0x5d   : > { %s2637_s0 = sld [smem:[#allocation25_spill]]  ;;  %p2638_p0 = pneg %p2200_p12 }
  0x63   : > { %s1874_s27 = scalar_lea.hbm %s2637_s0, 64 }
  0x64   : > { %p1875_p10 = scmp.ne.s32.totalorder %s2637_s0, %s1874_s27  ;;  %p1881_p5 = scmp.lt.u32.totalorder %s1874_s27, %s2637_s0 }
  0x66   : > { %p1877_p3 = pnand %p1875_p10, %p2638_p0 }
  0x68   : > { %p1878_p7 = pneg %p1877_p3 }
  0x6a   : > { %p1883_p4 = pnand %p1881_p5, %p1878_p7 }
  0x6c   : > { %1886 = shalt.err (!%p1883_p4)
}
  0x6d   : > { %s1887_s24 = scalar_lea.vmem %s250_s12, 64  ;;  %p2639_p8 = pmov %p2638_p0 }
  0x6e   : > { %p1888_p11 = scmp.ne.s32.totalorder %s250_s12, %s1887_s24  ;;  %p1895_p6 = scmp.lt.s32.totalorder %s250_s12, %s250_s12 }
  0x6f   : > { %p1896_p9 = scmp.lt.s32.totalorder %s1887_s24, %s1887_s24 }
  0x70   : > { %p1890_p2 = pnand %p1888_p11, %p2639_p8 }
  0x71   : > { %p1897_p13 = por %p1896_p9, %p1895_p6 }
  0x72   : > { %p1891_p1 = pneg %p1890_p2 }
  0x74   : > { %p1898_p0 = pnand %p1897_p13, %p1891_p1 }
  0x76   : > { %1901 = shalt.err (!%p1898_p0)
}
  0x77   : > { %1617 = dma.hbm_to_vmem [thread:$0]  (!%p2200_p12), %s2637_s0, 64, %s250_s12, [#allocation5]  }
  0x78   : > { %p223_p10 = scmp.eq.s32.totalorder %s2161_s8, 2  ;;  %s55_s9 = sadd.s32 1, %s2064_s29 }
  0x79   : > { %p62_p3 = scmp.ne.s32.totalorder %s2064_s29, %s2060_s28  ;;  %p2640_p7 = scmp.ne.s32.totalorder %s2628_s19, 0 }
  0x7a   : > { %p2642_p5 = scmp.eq.s32.totalorder %s2068_s30, 0  ;;  %s275_s2 = sand.u32 1, %s2064_s29  }
  0x7b   : > { %s2331_s17 = scalar_select %p2640_p7, %s2064_s29, %s55_s9  }
  0x7c   : > { %p64_p4 = por %p2642_p5, %p62_p3  ;;  %p2335_p11 = por %p223_p10, %p62_p3 }
  0x7d   : > { %2641 = sst [smem:[#allocation24_spill]] %s2331_s17  ;;  %s1413_s20 = sshll.u32 %s275_s2, 3 }
  0x7e   : > { %s1414_s15 = sshll.u32 %s2068_s30, 7  ;;  %s277_s19 = scalar_lea.vmem [#allocation7], %s1413_s20 }
  0x7f   : > { %s2344_s12 = scalar_lea.hbm %s2595_s1, %s1414_s15  ;;  %s284_s18 = sshll.u32 %s277_s19, 4  ;;  %s2352_s18 = int_to_ptr.vmem [resolvable:$true] %s284_s18 }
  0x80   : > { %p2644_p12 = scmp.lt.s32.totalorder %s2068_s30, 3  ;;  %s2354_s9 = smul.u32 192, %s275_s2 }
  0x81   : > { %s1594_s21 = smul.u32 3072, %s2068_s30  ;;  %s2646_s15 = sand.u32 1, %s2068_s30  }
  0x82   : > { %p2348_p8 = pnand %p2644_p12, %p64_p4  ;;  %s274_s24 = scalar_lea.sflag [#allocation8], %s2646_s15 }
  0x83   : > { %s1902_s0 = scalar_lea.hbm %s2344_s12, 128  ;;  %s1907_s3 = scalar_lea.hbm %s2595_s1, 384 }
  0x84   : > { %p1903_p2 = scmp.ne.s32.totalorder %s2344_s12, %s1902_s0  ;;  %p1904_p1 = pneg %p2348_p8 }
  0x85   : > { %p1908_p13 = scmp.lt.u32.totalorder %s2344_s12, %s2595_s1  ;;  %p1909_p0 = scmp.lt.u32.totalorder %s1907_s3, %s1902_s0 }
  0x86   : > { %p1905_p6 = pnand %p1904_p1, %p1903_p2  ;;  %p1911_p3 = scmp.lt.u32.totalorder %s1902_s0, %s2344_s12 }
  0x87   : > { %p1910_p10 = por %p1909_p0, %p1908_p13 }
  0x88   : > { %p1906_p9 = pneg %p1905_p6 }
  0x89   : > { %p1912_p7 = por %p1911_p3, %p1910_p10 }
  0x8b   : > { %p1913_p5 = pnand %p1912_p7, %p1906_p9 }
  0x8d   : > { %1916 = shalt.err (!%p1913_p5)
}
  0x8e   : > { %s1917_s2 = scalar_lea.vmem %s2352_s18, 128  ;;  %s2075_s15 = smov [#allocation7]  }
  0x8f   : > { %p1918_p4 = scmp.ne.s32.totalorder %s2352_s18, %s1917_s2  ;;  %s1922_s20 = sshll.u32 %s2075_s15, 4  ;;  %s1923_s20 = int_to_ptr.vmem [resolvable:$false] %s1922_s20 }
  0x90   : > { %s1924_s29 = scalar_lea.vmem %s1923_s20, 256  ;;  %p1925_p6 = scmp.lt.s32.totalorder %s2352_s18, %s1923_s20 }
  0x91   : > { %p1920_p12 = pnand %p1918_p4, %p1904_p1  ;;  %p1926_p13 = scmp.lt.s32.totalorder %s1924_s29, %s1917_s2 }
  0x93   : > { %p1921_p2 = pneg %p1920_p12  ;;  %p1927_p0 = por %p1926_p13, %p1925_p6 }
  0x95   : > { %p1928_p10 = pnand %p1927_p0, %p1921_p2 }
  0x97   : > { %1931 = shalt.err (!%p1928_p10)
}
  0x98   : > { %1624 = dma.hbm_to_vmem [thread:$0]  (!%p2348_p8), %s2344_s12, 128, %s2352_s18, %s274_s24  }
  0x99   : > { %s2389_s17 = scalar_lea.hbm %s2598_s4, %s1594_s21  ;;  %s319_s19 = scalar_lea.vmem [#allocation12], %s2354_s9 }
  0x9a   : > { %s326_s2 = sshll.u32 %s319_s19, 4  ;;  %s1932_s15 = scalar_lea.hbm %s2389_s17, 3072  ;;  %s2392_s2 = int_to_ptr.vmem [resolvable:$true] %s326_s2 }
  0x9b   : > { %p1933_p9 = scmp.ne.s32.totalorder %s2389_s17, %s1932_s15  ;;  %s1937_s24 = scalar_lea.hbm %s2598_s4, 9216 }
  0x9c   : > { %p1938_p5 = scmp.lt.u32.totalorder %s2389_s17, %s2598_s4  ;;  %p1939_p4 = scmp.lt.u32.totalorder %s1937_s24, %s1932_s15 }
  0x9d   : > { %p1935_p3 = pnand %p1933_p9, %p1904_p1  ;;  %p1941_p2 = scmp.lt.u32.totalorder %s1932_s15, %s2389_s17 }
  0x9e   : > { %p1940_p12 = por %p1939_p4, %p1938_p5 }
  0x9f   : > { %p1936_p7 = pneg %p1935_p3 }
  0xa0   : > { %p1942_p6 = por %p1941_p2, %p1940_p12 }
  0xa2   : > { %p1943_p13 = pnand %p1942_p6, %p1936_p7 }
  0xa4   : > { %1946 = shalt.err (!%p1943_p13)
}
  0xa5   : > { %s1947_s9 = scalar_lea.vmem %s2392_s2, 3072  ;;  %s2076_s29 = smov [#allocation12]  }
  0xa6   : > { %p1948_p0 = scmp.ne.s32.totalorder %s2392_s2, %s1947_s9  ;;  %s1952_s0 = sshll.u32 %s2076_s29, 4  ;;  %s1953_s0 = int_to_ptr.vmem [resolvable:$false] %s1952_s0 }
  0xa7   : > { %s1954_s3 = scalar_lea.vmem %s1953_s0, 6144  ;;  %p1955_p3 = scmp.lt.s32.totalorder %s2392_s2, %s1953_s0 }
  0xa8   : > { %p1950_p10 = pnand %p1948_p0, %p1904_p1  ;;  %p1956_p5 = scmp.lt.s32.totalorder %s1954_s3, %s1947_s9 }
  0xaa   : > { %p1951_p9 = pneg %p1950_p10  ;;  %p1957_p4 = por %p1956_p5, %p1955_p3 }
  0xac   : > { %p1958_p12 = pnand %p1957_p4, %p1951_p9 }
  0xae   : > { %1961 = shalt.err (!%p1958_p12)
}
  0xaf   : > { %1630 = dma.hbm_to_vmem [thread:$0]  (!%p2348_p8), %s2389_s17, 3072, %s2392_s2, %s2272_s7, %s2636_s22, %s2636_s22, %s2635_s14  }
  0xb0   : > { %p2647_p1 = scmp.ne.s32.totalorder %s2626_s13, 0 }
  0xb1   : > { %p2648_p7 = scmp.eq.s32.totalorder (!%p2647_p1), %s2161_s8, 0 }
  0xb2   : > { %351 = sbr.rel (%p2647_p1) target bundleno = 1014 (0x3f6), region = 48 }
  0xb9   : > { %2019 = dma.done.wait (%p2648_p7), [#allocation5], 64   ;;  %p2649_p2 = pmov %p2648_p7 }
  0xba   : > { %s357_s23 = sand.u32 1, %s2161_s8   ;;  %s2429_s19 = sand.u32 1, %s2060_s28  }
  0xbb   : > { %2021 = vsyncadd (%p2649_p2), [#allocation5], 4294967232  ;;  %s1420_s15 = sshll.u32 %s2429_s19, 3  ;;  %s358_s12 = scalar_lea.sflag [#allocation8], %s357_s23 }
  0xbc   : > { %s2432_s18 = scalar_lea.vmem [#allocation7], %s1420_s15  ;;  %p2650_p8 = scmp.ne.s32.totalorder %s2622_s10, 0 }
  0xbe   : > { %2023 = dma.done.wait (%p2650_p8), %s358_s12, 128  }
  0xbf   : > { %2025 = vsyncadd (%p2650_p8), %s358_s12, 4294967168  ;;  %p2651_p6 = pmov %p2649_p2 }
  0xc0   : > { %p2652_p13 = pmov %p2649_p2 }
  0xc1   : > { %2027 = dma.done.wait (%p2651_p6), [#allocation8], 3072  }
  0xc2   : > { %2029 = vsyncadd (%p2652_p13), [#allocation8], 4294964224  ;;  %s372_s7 = sand.u32 1, %s2048_s25   ;;  %s371_s14 = scalar_lea.sflag [#allocation11], %s357_s23 }
  0xc3   : > { %s1595_s13 = smul.u32 192, %s372_s7  ;;  %p2653_p0 = scmp.ne.s32.totalorder %s2623_s11, 0 }
  0xc5   : > { %s2443_s22 = scalar_lea.vmem [#allocation10], %s1595_s13 }
  0xc6   : > { %2031 = dma.done.wait (%p2653_p0), %s371_s14, 3072  }
  0xc7   : > { %2033 = vsyncadd (%p2653_p0), %s371_s14, 4294964224  ;;  %s1596_s17 = smul.u32 192, %s2429_s19 }
  0xc9   : > { %s2450_s2 = scalar_lea.vmem [#allocation12], %s1596_s17 }
  0xca   : > { %2035 = dma.done.wait (%p2650_p8), %s371_s14, 3072  }
  0xcb   : > { %2037 = vsyncadd (%p2650_p8), %s371_s14, 4294964224  ;;  %p434_p10 = scmp.lt.s32.totalorder %s2161_s8, 2  ;;  %s2470_s23 = scalar_lea.vmem [#allocation13], %s1420_s15 }
  0xcc   : > { %p2654_p9 = scmp.ne.s32.totalorder %s2161_s8, 0 }
  0xcd   : > { %s2458_s24 = scalar_select %p434_p10, %s2161_s8, 2 }
  0xce   : > { %445 = sbr.rel (%p2654_p9) target bundleno = 455 (0x1c7), region = 72  ;;  %v1710_v0 = vld [vmem:[#allocation9 + $0x4] ss:$12 sps:$4 sm:$0xff] (!%p2654_p9)   ;;  %v2077_v1 = vmov (!%p2654_p9), 0.0   ;;  %v1712_v2 = vld [vmem:[#allocation9 + $0x8] ss:$12 sps:$4 sm:$0xff] (!%p2654_p9)  }
  0xcf   : > { %s1597_s21 = smul.u32 3, %s2458_s24  ;;  %s440_s9 = scalar_lea.vmem %s2600_s6, %s2458_s24  ;;  %1531 = vmatprep.subr.bf16.mxu1 (!%p2654_p9), %v2077_v1  ;;  %vm2078_vm0 = vmmov (!%p2654_p9), 0   ;;  %607 = vmatprep.subr.bf16.mxu0 (!%p2654_p9), %v1710_v0  ;;  %v1713_v3 = vld [vmem:[#allocation9] ss:$12 sps:$4 sm:$0xff] (!%p2654_p9)   ;;  %v1714_v4 = vld [vmem:[#allocation9 + $0x1c] ss:$12 sps:$4 sm:$0xff] (!%p2654_p9)  }
  0xd0   : > { %1547 = vmatprep.mubr.msk.bf16.mxu1 (!%p2654_p9), %vm2078_vm0, %v2077_v1  ;;  %1532 = vmatpush3.bf16.msra.mxu1 (!%p2654_p9), %v1712_v2  ;;  %v2079_v5 = vmov (!%p2654_p9), 0   ;;  %v1716_v6 = vld [vmem:[#allocation9 + $0x20] ss:$12 sps:$4 sm:$0xff] (!%p2654_p9)   ;;  %v1717_v7 = vld [vmem:[#allocation9 + $0x18] ss:$12 sps:$4 sm:$0xff] (!%p2654_p9)  }
  0xd1   : > { %s2468_s3 = scalar_lea.vmem %s2599_s5, %s1597_s21  ;;  %639 = vmatprep.mubr.bf16.mxu0 (!%p2654_p9), %v2079_v5  ;;  %608 = vmatpush1.bf16.msra.mxu0 (!%p2654_p9), %v1713_v3  ;;  %v1718_v8 = vld [vmem:[#allocation9 + $0x34] ss:$12 sps:$4 sm:$0xff] (!%p2654_p9)   ;;  %v1720_v9 = vld [vmem:[#allocation9 + $0x38] ss:$12 sps:$4 sm:$0xff] (!%p2654_p9)   ;;  %v1721_v10 = vld [vmem:[#allocation9 + $0x30] ss:$12 sps:$4 sm:$0xff] (!%p2654_p9)  }
  0xd2   : > { %1533 = vmatprep.subr.bf16.mxu1 (!%p2654_p9), %v2077_v1  ;;  %609 = vmatprep.subr.bf16.mxu0 (!%p2654_p9), %v1714_v4  ;;  %v1722_v11 = vld [vmem:[#allocation9 + $0x4c] ss:$12 sps:$4 sm:$0xff] (!%p2654_p9)   ;;  %v1724_v12 = vld [vmem:[#allocation9 + $0x50] ss:$12 sps:$4 sm:$0xff] (!%p2654_p9)   ;;  %v1725_v13 = vld [vmem:[#allocation9 + $0x48] ss:$12 sps:$4 sm:$0xff] (!%p2654_p9)  }
  0xd3   : > { %v1726_v14 = vld [vmem:[#allocation9 + $0x64] ss:$12 sps:$4 sm:$0xff] (!%p2654_p9)   ;;  %v1728_v15 = vld [vmem:[#allocation9 + $0x68] ss:$12 sps:$4 sm:$0xff] (!%p2654_p9)   ;;  %v1729_v16 = vld [vmem:[#allocation9 + $0x60] ss:$12 sps:$4 sm:$0xff] (!%p2654_p9)  }
  0xd4   : > { %1534 = vmatpush3.bf16.msra.mxu1 (!%p2654_p9), %v1716_v6  ;;  %v1730_v17 = vld [vmem:[#allocation9 + $0x7c] ss:$12 sps:$4 sm:$0xff] (!%p2654_p9)   ;;  %v1732_v18 = vld [vmem:[#allocation9 + $0x80] ss:$12 sps:$4 sm:$0xff] (!%p2654_p9)   ;;  %v1733_v19 = vld [vmem:[#allocation9 + $0x78] ss:$12 sps:$4 sm:$0xff] (!%p2654_p9)  }
  0xd5   : > { %610 = vmatpush1.bf16.msra.mxu0 %v1717_v7  ;;  %1535 = vmatprep.subr.bf16.mxu1 %v2077_v1  ;;  %v1734_v20 = vld [vmem:[#allocation9 + $0x94] ss:$12 sps:$4 sm:$0xff]   ;;  %v1736_v21 = vld [vmem:[#allocation9 + $0x98] ss:$12 sps:$4 sm:$0xff]   ;;  %v1737_v22 = vld [vmem:[#allocation9 + $0x90] ss:$12 sps:$4 sm:$0xff]  }
  0xd6   : > { %611 = vmatprep.subr.bf16.mxu0 %v1718_v8  ;;  %v1738_v23 = vld [vmem:[#allocation9 + $0xac] ss:$12 sps:$4 sm:$0xff]   ;;  %v1740_v24 = vld [vmem:[#allocation9 + $0xb0] ss:$12 sps:$4 sm:$0xff]   ;;  %v1741_v25 = vld [vmem:[#allocation9 + $0xa8] ss:$12 sps:$4 sm:$0xff]  }
  0xd7   : > { %v446_v26 = vld [vmem:[#allocation4] sm:$0xf] }
  0xd8   : > { %1536 = vmatpush3.bf16.msra.mxu1 %v1720_v9 }
  0xd9   : > { %612 = vmatpush1.bf16.msra.mxu0 %v1721_v10  ;;  %1537 = vmatprep.subr.bf16.mxu1 %v2077_v1 }
  0xda   : > { %613 = vmatprep.subr.bf16.mxu0 %v1722_v11 }
  0xdc   : > { %1538 = vmatpush3.bf16.msra.mxu1 %v1724_v12 }
  0xdd   : > { %614 = vmatpush1.bf16.msra.mxu0 %v1725_v13  ;;  %1539 = vmatprep.subr.bf16.mxu1 %v2077_v1 }
  0xde   : > { %615 = vmatprep.subr.bf16.mxu0 %v1726_v14 }
  0xe0   : > { %1540 = vmatpush3.bf16.msra.mxu1 %v1728_v15 }
  0xe1   : > { %616 = vmatpush1.bf16.msra.mxu0 %v1729_v16  ;;  %1541 = vmatprep.subr.bf16.mxu1 %v2077_v1 }
  0xe2   : > { %617 = vmatprep.subr.bf16.mxu0 %v1730_v17 }
  0xe4   : > { %1542 = vmatpush3.bf16.msra.mxu1 %v1732_v18 }
  0xe5   : > { %618 = vmatpush1.bf16.msra.mxu0 %v1733_v19  ;;  %1543 = vmatprep.subr.bf16.mxu1 %v2077_v1 }
  0xe6   : > { %619 = vmatprep.subr.bf16.mxu0 %v1734_v20 }
  0xe8   : > { %1544 = vmatpush3.bf16.msra.mxu1 %v1736_v21 }
  0xe9   : > { %620 = vmatpush1.bf16.msra.mxu0 %v1737_v22  ;;  %1545 = vmatprep.subr.bf16.mxu1 %v2077_v1 }
  0xea   : > { %621 = vmatprep.subr.bf16.mxu0 %v1738_v23 }
  0xec   : > { %1546 = vmatpush3.bf16.msra.mxu1 %v1740_v24 }
  0xed   : > { %622 = vmatpush1.bf16.msra.mxu0 %v1741_v25 }
  0xef   : > { %1548 = vmatmul.mubr.bf16.vlgmr.msra.gmra.mrb[0].mxu1 %v446_v26 }
  0xf0   : > { %640 = vmatmul.mubr.bf16.vlgmr.msra.gmra.mrb[0].mxu0 %v446_v26 }
 0x1c2   : > { %v682_v27 = vpop.f32.mrb[0].mxu1 }
 0x1c3   : > { %690 = vst [vmem:[#allocation2 + $0x10] sm:$0xff] %v682_v27  ;;  %v641_v28 = vpop.f32.mrb[0].mxu0  ;;  %v1549_v29 = vpop.f32.mrb[1].mxu1 }
 0x1c4   : > { %688 = vst [vmem:[#allocation2] sm:$0xff] %v641_v28  ;;  %v643_v30 = vpop.f32.mrb[1].mxu0  ;;  %v685_v31 = vpop.f32.mrb[2].mxu1 }
 0x1c5   : > { %689 = vst [vmem:[#allocation2 + $0x8] sm:$0xff] %v643_v30  ;;  %v645_v32 = vpop.f32.mrb[2].mxu0  ;;  %v1550_v33 = vpop.f32.mrb[3].mxu1 }
 0x1c6   : > { %v646_v34 = vpop.f32.mrb[3].mxu0 }
 0x1c7 PF: > { %p2655_p3 = scmp.eq.s32.totalorder %s2161_s8, 0 }
 0x1c8   : > { %v1742_v35 = vld [vmem:[%s2443_s22 + $0x4] ss:$12 sps:$4 sm:$0xff] (!%p2655_p3)   ;;  %v2080_v36 = vmov (!%p2655_p3), 0.0   ;;  %v1744_v37 = vld [vmem:[%s2443_s22 + $0x8] ss:$12 sps:$4 sm:$0xff] (!%p2655_p3)   ;;  %vm2081_vm1 = vmmov (!%p2655_p3), 0  }
 0x1c9   : > { %694 = sbr.rel (%p2655_p3) target bundleno = 705 (0x2c1), region = 76  ;;  %1551 = vmatprep.subr.bf16.mxu1 (!%p2655_p3), %v2080_v36  ;;  %1567 = vmatprep.mubr.msk.bf16.mxu1 (!%p2655_p3), %vm2081_vm1, %v2080_v36  ;;  %v1745_v38 = vld [vmem:[%s2443_s22] ss:$12 sps:$4 sm:$0xff] (!%p2655_p3)   ;;  %v1746_v39 = vld [vmem:[%s2443_s22 + $0x1c] ss:$12 sps:$4 sm:$0xff] (!%p2655_p3)   ;;  %v2082_v40 = vmov (!%p2655_p3), 0  }
 0x1ca   : > { %856 = vmatprep.subr.bf16.mxu0 (!%p2655_p3), %v1742_v35  ;;  %1552 = vmatpush3.bf16.msra.mxu1 (!%p2655_p3), %v1744_v37  ;;  %v1748_v41 = vld [vmem:[%s2443_s22 + $0x20] ss:$12 sps:$4 sm:$0xff] (!%p2655_p3)   ;;  %v1749_v42 = vld [vmem:[%s2443_s22 + $0x18] ss:$12 sps:$4 sm:$0xff] (!%p2655_p3)   ;;  %v1753_v45 = vld [vmem:[%s2443_s22 + $0x30] ss:$12 sps:$4 sm:$0xff] (!%p2655_p3)  }
 0x1cb   : > { %888 = vmatprep.mubr.bf16.mxu0 (!%p2655_p3), %v2082_v40  ;;  %857 = vmatpush1.bf16.msra.mxu0 (!%p2655_p3), %v1745_v38  ;;  %v1750_v43 = vld [vmem:[%s2443_s22 + $0x34] ss:$12 sps:$4 sm:$0xff] (!%p2655_p3)   ;;  %v1752_v44 = vld [vmem:[%s2443_s22 + $0x38] ss:$12 sps:$4 sm:$0xff] (!%p2655_p3)   ;;  %v1756_v47 = vld [vmem:[%s2443_s22 + $0x50] ss:$12 sps:$4 sm:$0xff] (!%p2655_p3)  }
 0x1cc   : > { %1553 = vmatprep.subr.bf16.mxu1 (!%p2655_p3), %v2080_v36  ;;  %858 = vmatprep.subr.bf16.mxu0 (!%p2655_p3), %v1746_v39  ;;  %v1754_v46 = vld [vmem:[%s2443_s22 + $0x4c] ss:$12 sps:$4 sm:$0xff] (!%p2655_p3)   ;;  %v1757_v48 = vld [vmem:[%s2443_s22 + $0x48] ss:$12 sps:$4 sm:$0xff] (!%p2655_p3)   ;;  %v1758_v49 = vld [vmem:[%s2443_s22 + $0x64] ss:$12 sps:$4 sm:$0xff] (!%p2655_p3)  }
 0x1cd   : > { %v1760_v50 = vld [vmem:[%s2443_s22 + $0x68] ss:$12 sps:$4 sm:$0xff] (!%p2655_p3)   ;;  %v1761_v51 = vld [vmem:[%s2443_s22 + $0x60] ss:$12 sps:$4 sm:$0xff] (!%p2655_p3)   ;;  %v1765_v54 = vld [vmem:[%s2443_s22 + $0x78] ss:$12 sps:$4 sm:$0xff] (!%p2655_p3)  }
 0x1ce   : > { %1554 = vmatpush3.bf16.msra.mxu1 (!%p2655_p3), %v1748_v41  ;;  %v1762_v52 = vld [vmem:[%s2443_s22 + $0x7c] ss:$12 sps:$4 sm:$0xff] (!%p2655_p3)   ;;  %v1764_v53 = vld [vmem:[%s2443_s22 + $0x80] ss:$12 sps:$4 sm:$0xff] (!%p2655_p3)   ;;  %v1768_v56 = vld [vmem:[%s2443_s22 + $0x98] ss:$12 sps:$4 sm:$0xff] (!%p2655_p3)  }
 0x1cf   : > { %859 = vmatpush1.bf16.msra.mxu0 (!%p2655_p3), %v1749_v42  ;;  %1555 = vmatprep.subr.bf16.mxu1 (!%p2655_p3), %v2080_v36  ;;  %v1766_v55 = vld [vmem:[%s2443_s22 + $0x94] ss:$12 sps:$4 sm:$0xff] (!%p2655_p3)   ;;  %v1769_v57 = vld [vmem:[%s2443_s22 + $0x90] ss:$12 sps:$4 sm:$0xff] (!%p2655_p3)   ;;  %v1770_v58 = vld [vmem:[%s2443_s22 + $0xac] ss:$12 sps:$4 sm:$0xff] (!%p2655_p3)  }
 0x1d0   : > { %860 = vmatprep.subr.bf16.mxu0 %v1750_v43  ;;  %v1772_v59 = vld [vmem:[%s2443_s22 + $0xb0] ss:$12 sps:$4 sm:$0xff]   ;;  %v1773_v60 = vld [vmem:[%s2443_s22 + $0xa8] ss:$12 sps:$4 sm:$0xff]  }
 0x1d1   : > { %v695_v61 = vld [vmem:[#allocation3] sm:$0xf] }
 0x1d2   : > { %1556 = vmatpush3.bf16.msra.mxu1 %v1752_v44 }
 0x1d3   : > { %861 = vmatpush1.bf16.msra.mxu0 %v1753_v45  ;;  %1557 = vmatprep.subr.bf16.mxu1 %v2080_v36 }
 0x1d4   : > { %862 = vmatprep.subr.bf16.mxu0 %v1754_v46 }
 0x1d6   : > { %1558 = vmatpush3.bf16.msra.mxu1 %v1756_v47 }
 0x1d7   : > { %863 = vmatpush1.bf16.msra.mxu0 %v1757_v48  ;;  %1559 = vmatprep.subr.bf16.mxu1 %v2080_v36 }
 0x1d8   : > { %864 = vmatprep.subr.bf16.mxu0 %v1758_v49 }
 0x1da   : > { %1560 = vmatpush3.bf16.msra.mxu1 %v1760_v50 }
 0x1db   : > { %865 = vmatpush1.bf16.msra.mxu0 %v1761_v51  ;;  %1561 = vmatprep.subr.bf16.mxu1 %v2080_v36 }
 0x1dc   : > { %866 = vmatprep.subr.bf16.mxu0 %v1762_v52 }
 0x1de   : > { %1562 = vmatpush3.bf16.msra.mxu1 %v1764_v53 }
 0x1df   : > { %867 = vmatpush1.bf16.msra.mxu0 %v1765_v54  ;;  %1563 = vmatprep.subr.bf16.mxu1 %v2080_v36 }
 0x1e0   : > { %868 = vmatprep.subr.bf16.mxu0 %v1766_v55 }
 0x1e2   : > { %1564 = vmatpush3.bf16.msra.mxu1 %v1768_v56 }
 0x1e3   : > { %869 = vmatpush1.bf16.msra.mxu0 %v1769_v57  ;;  %1565 = vmatprep.subr.bf16.mxu1 %v2080_v36 }
 0x1e4   : > { %870 = vmatprep.subr.bf16.mxu0 %v1770_v58 }
 0x1e6   : > { %1566 = vmatpush3.bf16.msra.mxu1 %v1772_v59 }
 0x1e7   : > { %871 = vmatpush1.bf16.msra.mxu0 %v1773_v60 }
 0x1e9   : > { %1568 = vmatmul.mubr.bf16.vlgmr.msra.gmra.mrb[0].mxu1 %v695_v61 }
 0x1ea   : > { %889 = vmatmul.mubr.bf16.vlgmr.msra.gmra.mrb[0].mxu0 %v695_v61 }
 0x2bc   : > { %v931_v62 = vpop.f32.mrb[0].mxu1 }
 0x2bd   : > { %939 = vst [vmem:[#allocation2 + $0x10] sm:$0xff] %v931_v62  ;;  %v890_v63 = vpop.f32.mrb[0].mxu0  ;;  %v1569_v0 = vpop.f32.mrb[1].mxu1 }
 0x2be   : > { %937 = vst [vmem:[#allocation2] sm:$0xff] %v890_v63  ;;  %v892_v1 = vpop.f32.mrb[1].mxu0  ;;  %v934_v2 = vpop.f32.mrb[2].mxu1 }
 0x2bf   : > { %938 = vst [vmem:[#allocation2 + $0x8] sm:$0xff] %v892_v1  ;;  %v894_v3 = vpop.f32.mrb[2].mxu0  ;;  %v1570_v4 = vpop.f32.mrb[3].mxu1 }
 0x2c0   : > { %v895_v5 = vpop.f32.mrb[3].mxu0 }
 0x2c1 PF: > { %v1774_v6 = vld [vmem:[%s2450_s2 + $0x4] ss:$12 sps:$4 sm:$0xff]   ;;  %v1776_v7 = vld [vmem:[%s2450_s2] ss:$12 sps:$4 sm:$0xff]   ;;  %v2083_v8 = vmov 0.0   ;;  %v2084_v9 = vmov 0   ;;  %v1188_v34 = vlaneseq }
 0x2c2   : > { %1571 = vmatprep.subr.bf16.mxu1 %v2083_v8  ;;  %1134 = vmatprep.mubr.bf16.mxu0 %v2084_v9  ;;  %v1777_v10 = vld [vmem:[%s2450_s2 + $0x1c] ss:$12 sps:$4 sm:$0xff]   ;;  %vm2085_vm2 = vmmov 0   ;;  %v1779_v11 = vld [vmem:[%s2450_s2 + $0x18] ss:$12 sps:$4 sm:$0xff]   ;;  %s1501_s12 = sshll.u32 %s2161_s8, 7 }
 0x2c3   : > { %1102 = vmatprep.subr.bf16.mxu0 %v1774_v6  ;;  %1587 = vmatprep.mubr.msk.bf16.mxu1 %vm2085_vm2, %v2083_v8  ;;  %v1780_v12 = vld [vmem:[%s2450_s2 + $0x34] ss:$12 sps:$4 sm:$0xff]   ;;  %v1782_v13 = vld [vmem:[%s2450_s2 + $0x30] ss:$12 sps:$4 sm:$0xff]   ;;  %v1783_v14 = vld [vmem:[%s2450_s2 + $0x4c] ss:$12 sps:$4 sm:$0xff]  }
 0x2c4   : > { %1103 = vmatpush1.bf16.msra.mxu0 %v1776_v7  ;;  %v1794_v15 = vld [vmem:[%s2450_s2 + $0x8] ss:$12 sps:$4 sm:$0xff]   ;;  %v1786_v17 = vld [vmem:[%s2450_s2 + $0x64] ss:$12 sps:$4 sm:$0xff]   ;;  %v1798_v18 = vld [vmem:[%s2450_s2 + $0x20] ss:$12 sps:$4 sm:$0xff]  }
 0x2c5   : > { %1104 = vmatprep.subr.bf16.mxu0 %v1777_v10  ;;  %v1785_v16 = vld [vmem:[%s2450_s2 + $0x48] ss:$12 sps:$4 sm:$0xff]   ;;  %1572 = vmatpush3.bf16.msra.mxu1 %v1794_v15  ;;  %v1788_v19 = vld [vmem:[%s2450_s2 + $0x60] ss:$12 sps:$4 sm:$0xff]   ;;  %v1800_v20 = vld [vmem:[%s2450_s2 + $0x38] ss:$12 sps:$4 sm:$0xff]  }
 0x2c6   : > { %1573 = vmatprep.subr.bf16.mxu1 %v2083_v8  ;;  %v1789_v21 = vld [vmem:[%s2450_s2 + $0x7c] ss:$12 sps:$4 sm:$0xff]   ;;  %v1791_v22 = vld [vmem:[%s2450_s2 + $0x78] ss:$12 sps:$4 sm:$0xff]   ;;  %v1792_v24 = vld [vmem:[%s2450_s2 + $0x94] ss:$12 sps:$4 sm:$0xff]  }
 0x2c7   : > { %v1801_v23 = vld [vmem:[%s2450_s2 + $0x50] ss:$12 sps:$4 sm:$0xff]   ;;  %v1802_v26 = vld [vmem:[%s2450_s2 + $0x68] ss:$12 sps:$4 sm:$0xff]   ;;  %v1796_v27 = vld [vmem:[%s2450_s2 + $0xac] ss:$12 sps:$4 sm:$0xff]  }
 0x2c8   : > { %1105 = vmatpush1.bf16.msra.mxu0 %v1779_v11  ;;  %v1795_v25 = vld [vmem:[%s2450_s2 + $0x90] ss:$12 sps:$4 sm:$0xff]   ;;  %v1799_v28 = vld [vmem:[%s2450_s2 + $0xa8] ss:$12 sps:$4 sm:$0xff]   ;;  %v1803_v30 = vld [vmem:[%s2450_s2 + $0x80] ss:$12 sps:$4 sm:$0xff]  }
 0x2c9   : > { %1106 = vmatprep.subr.bf16.mxu0 %v1780_v12  ;;  %1574 = vmatpush3.bf16.msra.mxu1 %v1798_v18  ;;  %v2522_v29 = vld [vmem:[%s2432_s18] sm:$0xff]  ;;  %v1189_v35 = vshrl.u32 %v1188_v34, 7  ;;  %v1186_v37 = vld [vmem:[%s2468_s3] sm:$0x7]  ;;  %s1251_s18 = sshll.u32 %s2470_s23, 4  ;;  %s2656_s14 = sld [smem:[#allocation28_spill]]  ;;  %s2543_s18 = int_to_ptr.vmem [resolvable:$true] %s1251_s18 }
 0x2ca   : > { %1575 = vmatprep.subr.bf16.mxu1 %v2083_v8  ;;  %v941_v31 = vpack.c.bf16 %v2522_v29, %v2522_v29  ;;  %v1804_v32 = vld [vmem:[%s2450_s2 + $0x98] ss:$12 sps:$4 sm:$0xff]   ;;  %v1805_v33 = vld [vmem:[%s2450_s2 + $0xb0] ss:$12 sps:$4 sm:$0xff]   ;;  %v1499_v60 = vld [vmem:[%s440_s9] ss:$0 sm:$0xff] }
 0x2cb   : > { %v1190_v36 = vsub.s32 0, %v1189_v35  ;;  %v1183_v39 = vld [vmem:[#allocation2] sm:$0xff]  ;;  %v1194_v41 = vsub.s32 1, %v1189_v35  ;;  %v1184_v46 = vld [vmem:[#allocation2 + $0x8] sm:$0xff]  ;;  %v1198_v59 = vsub.s32 2, %v1189_v35  ;;  %v1185_v62 = vld [vmem:[#allocation2 + $0x10] sm:$0xff] }
 0x2cc   : > { %1107 = vmatpush1.bf16.msra.mxu0 %v1782_v13  ;;  %s1238_s17 = scalar_lea.sflag [#allocation6], %s2429_s19  ;;  %s1962_s2 = scalar_lea.vmem %s2543_s18, 128 }
 0x2cd   : > { %1108 = vmatprep.subr.bf16.mxu0 %v1783_v14  ;;  %1576 = vmatpush3.bf16.msra.mxu1 %v1800_v20  ;;  %v1191_v38 = vrot.slane %v1186_v37, %v1190_v36  ;;  %v1195_v45 = vrot.slane %v1186_v37, %v1194_v41  ;;  %v1199_v61 = vrot.slane %v1186_v37, %v1198_v59  ;;  %p1963_p5 = scmp.ne.s32.totalorder %s2543_s18, %s1962_s2  ;;  %s2086_s8 = smov [#allocation13]  }
 0x2ce   : > { %1577 = vmatprep.subr.bf16.mxu1 %v2083_v8  ;;  %s1966_s24 = sshll.u32 %s2086_s8, 4  ;;  %s1967_s24 = int_to_ptr.vmem [resolvable:$false] %s1966_s24 }
 0x2cf   : > { %v1203_v40 = vadd.f32 %v1191_v38, %v1183_v39  ;;  %v1204_v50 = vadd.f32 %v1195_v45, %v1184_v46  ;;  %v1205_v1 = vadd.f32 %v1199_v61, %v1185_v62  ;;  %s2541_s22 = scalar_lea.hbm %s2656_s14, %s1501_s12  ;;  %p1964_p4 = pnand %p1963_p5, %p2335_p11 }
 0x2d0   : > { %1109 = vmatpush1.bf16.msra.mxu0 %v1785_v16  ;;  %s1968_s21 = scalar_lea.vmem %s1967_s24, 256  ;;  %p1969_p1 = scmp.lt.s32.totalorder %s2543_s18, %s1967_s24 }
 0x2d1   : > { %1110 = vmatprep.subr.bf16.mxu0 %v1786_v17  ;;  %1578 = vmatpush3.bf16.msra.mxu1 %v1801_v23  ;;  %p1965_p12 = pneg %p1964_p4  ;;  %p1970_p7 = scmp.lt.s32.totalorder %s1968_s21, %s1962_s2 }
 0x2d2   : > { %1579 = vmatprep.subr.bf16.mxu1 %v2083_v8 }
 0x2d3   : > { %p1971_p2 = por %p1970_p7, %p1969_p1 }
 0x2d4   : > { %1111 = vmatpush1.bf16.msra.mxu0 %v1788_v19 }
 0x2d5   : > { %1112 = vmatprep.subr.bf16.mxu0 %v1789_v21  ;;  %1580 = vmatpush3.bf16.msra.mxu1 %v1802_v26  ;;  %p1972_p8 = pnand %p1971_p2, %p1965_p12 }
 0x2d6   : > { %1581 = vmatprep.subr.bf16.mxu1 %v2083_v8 }
 0x2d8   : > { %1113 = vmatpush1.bf16.msra.mxu0 %v1791_v22 }
 0x2d9   : > { %1114 = vmatprep.subr.bf16.mxu0 %v1792_v24  ;;  %1582 = vmatpush3.bf16.msra.mxu1 %v1803_v30 }
 0x2da   : > { %1583 = vmatprep.subr.bf16.mxu1 %v2083_v8 }
 0x2dc   : > { %1115 = vmatpush1.bf16.msra.mxu0 %v1795_v25 }
 0x2dd   : > { %1116 = vmatprep.subr.bf16.mxu0 %v1796_v27  ;;  %1584 = vmatpush3.bf16.msra.mxu1 %v1804_v32 }
 0x2de   : > { %1585 = vmatprep.subr.bf16.mxu1 %v2083_v8 }
 0x2e0   : > { %1117 = vmatpush1.bf16.msra.mxu0 %v1799_v28 }
 0x2e1   : > { %1586 = vmatpush3.bf16.msra.mxu1 %v1805_v33 }
 0x2e3   : > { %1135 = vmatmul.mubr.bf16.vlgmr.msra.gmra.mrb[0].mxu0 %v941_v31 }
 0x2e4   : > { %1588 = vmatmul.mubr.bf16.vlgmr.msra.gmra.mrb[0].mxu1 %v941_v31 }
 0x3b6   : > { %v1136_v42 = vpop.f32.mrb[0].mxu0 }
 0x3b7   : > { %v1206_v43 = vadd.f32 %v1203_v40, %v1136_v42  ;;  %v1138_v44 = vpop.f32.mrb[1].mxu0  ;;  %v1177_v51 = vpop.f32.mrb[0].mxu1 }
 0x3b8   : > { %v1140_v47 = vpop.f32.mrb[2].mxu0  ;;  %v1207_v52 = vadd.f32 %v1204_v50, %v1138_v44  ;;  %v1589_v53 = vpop.f32.mrb[1].mxu1  ;;  %v1227_v63 = vadd.f32 %v1499_v60, %v1177_v51 }
 0x3b9   : > { %v1497_v48 = vmul.f32 -1.442695, %v1206_v43  ;;  %v1141_v49 = vpop.f32.mrb[3].mxu0  ;;  %v1180_v54 = vpop.f32.mrb[2].mxu1 }
 0x3ba   : > { %v1590_v55 = vpop.f32.mrb[3].mxu1  ;;  %v1498_v56 = vmul.f32 -1.442695, %v1207_v52 }
 0x3bb   : > { %1806 = vpow2.f32 %v1497_v48 }
 0x3bc   : > { %1808 = vpow2.f32 %v1498_v56 }
 0x3c5   : > { %v1807_v57 = vpop.eup %1806 }
 0x3c6   : > { %v1214_v58 = vadd.f32 1.0, %v1807_v57  ;;  %v1809_v0 = vpop.eup %1808 }
 0x3c7   : > { %v1215_v4 = vadd.f32 1.0, %v1809_v0 }
 0x3c8   : > { %1810 = vrcp.f32 %v1214_v58 }
 0x3d2   : > { %v1811_v2 = vpop.eup %1810 }
 0x3d3   : > { %v1228_v3 = vmul.f32 %v1811_v2, %v1227_v63 }
 0x3d5   : > { %v1229_v5 = vadd.f32 %v1228_v3, %v1205_v1 }
 0x3d7   : > { %1812 = vtanh.f32 %v1229_v5 }
 0x3d8   : > { %1814 = vrcp.f32 %v1215_v4 }
 0x3e1   : > { %v1813_v6 = vpop.eup %1812 }
 0x3e2   : > { %v1231_v7 = vsub.f32 %v2522_v29, %v1813_v6  ;;  %v1815_v8 = vpop.eup %1814 }
 0x3e4   : > { %v1232_v9 = vmul.f32 %v1815_v8, %v1231_v7 }
 0x3e6   : > { %v1233_v10 = vadd.f32 %v1813_v6, %v1232_v9 }
 0x3e8   : > { %v1234_v11 = vpack.c.bf16 %v1233_v10, %v1233_v10  ;;  %1236 = vst [vmem:[%s2470_s23] sm:$0xff] %v1233_v10 }
 0x3e9   : > { %1975 = shalt.err (!%p1972_p8)
}
 0x3ea   : > { %s1976_s19 = scalar_lea.hbm %s2541_s22, 128  ;;  %s1980_s9 = scalar_lea.hbm %s2656_s14, 384 }
 0x3eb   : > { %p1977_p6 = scmp.ne.s32.totalorder %s2541_s22, %s1976_s19  ;;  %p1981_p10 = scmp.lt.u32.totalorder %s2541_s22, %s2656_s14 }
 0x3ec   : > { %p1982_p9 = scmp.lt.u32.totalorder %s1980_s9, %s1976_s19  ;;  %p1984_p5 = scmp.lt.u32.totalorder %s1976_s19, %s2541_s22 }
 0x3ed   : > { %p1978_p13 = pnand %p1977_p6, %p2335_p11 }
 0x3ee   : > { %p1983_p3 = por %p1982_p9, %p1981_p10 }
 0x3ef   : > { %p1979_p0 = pneg %p1978_p13 }
 0x3f0   : > { %p1985_p4 = por %p1984_p5, %p1983_p3 }
 0x3f2   : > { %p1986_p12 = pnand %p1985_p4, %p1979_p0 }
 0x3f4   : > { %1989 = shalt.err (!%p1986_p12)
}
 0x3f5   : > { %1612 = dma.vmem_to_hbm [thread:$0]  (%p2335_p11), %s2543_s18, 128, %s2541_s22, %s1238_s17   ;;  %1235 = vst [vmem:[#allocation3] sm:$0xf] %v1234_v11 }
 0x3f6 PF: > { %s2657_s3 = sld [smem:[#allocation20_spill]]  ;;  %s2658_s23 = sld [smem:[#allocation22_spill]] }
 0x3f7   : > { %p1640_p1 = scmp.ge.s32.totalorder %s2068_s30, 2 }
 0x3fc   : > { %s1263_s10 = sand.u32 1, %s2657_s3   ;;  %p2659_p7 = scmp.ne.s32.totalorder %s2658_s23, 0 }
 0x3fd   : > { %s1264_s15 = scalar_lea.sflag [#allocation6], %s1263_s10 }
 0x3fe   : > { %p1632_p2 = pnand %p1640_p1, %p2659_p7 }
 0x400   : > { %2039 = dma.done.wait (!%p1632_p2), %s1264_s15, 128  }
 0x401   : > { %2041 = vsyncadd (!%p1632_p2), %s1264_s15, 4294967168  ;;  %s2660_s12 = sld [smem:[#allocation23_spill]]  ;;  %s2661_s7 = sld [smem:[#allocation21_spill]] }
 0x402   : > { %s2662_s29 = sld [smem:[#allocation24_spill]]  ;;  %p24_p11 = scmp.ge.s32.totalorder %s2196_s16, 5  }
 0x403   : > { %s2663_s24 = smov %s2048_s25  ;;  %s2664_s25 = smov %s2052_s26 }
 0x404   : > { %s2666_s27 = smov %s2060_s28  ;;  %s2668_s30 = smov %s2196_s16 }
 0x405   :  { %26 = sbr.rel (!%p24_p11) target bundleno = 15 (0xf), region = 140 }
 0x407   : > { %s2665_s26 = smov %s2660_s12  ;;  %s2667_s28 = smov %s2661_s7 }
 0x40c   :  { %1269 = vsyncpa [#allocation5], 1 }
 0x40d   :  { %1271 = vsyncpa [#allocation5 + $0x1], 1 }
 0x40e   :  { %1272 = vsyncpa [#allocation8], 1 }
 0x40f   :  { %1274 = vsyncpa [#allocation8 + $0x1], 1 }
 0x410   :  { %1275 = vsyncpa [#allocation11], 1 }
 0x411   :  { %1277 = vsyncpa [#allocation11 + $0x1], 1 }
 0x412   :  { %1278 = vsyncpa [#allocation6], 1 }
 0x413   :  { %1280 = vsyncpa [#allocation6 + $0x1], 1 }

</bundles_post_ra>
